<compile_context>
chip_gen: v7x
topology: tpu7x:2x2x1
jax: 0.10.0
libtpu: 0.0.40
codegen_flags: <defaults>
</compile_context>

<pallas_src>
import functools

import jax
import jax.numpy as jnp
from jax.experimental import pallas as pl
from jax.experimental.pallas import tpu as pltpu


def _round_up(x, m):
    return ((x + m - 1) // m) * m


def _cdiv(a, b):
    return -(-a // b)


def _vmem_budget_bytes():
    """Generation-aware VMEM budget and the value to pass as vmem_limit_bytes."""
    try:
        phys = int(pltpu.get_tpu_info().vmem_capacity_bytes)
    except Exception:
        phys = None
    if phys is None:
        # Unknown backend (e.g. interpret mode): stay under v5e's 16 MiB default scoped
        # VMEM and leave the compiler's own limit untouched.
        return 12 * 1024 * 1024, None
    budget = (phys * 3) // 4  # ~96 MiB on v5e/v6e (128 MiB), ~48 MiB on v7x (64 MiB)
    return budget, budget


def _pick_tb(budget_bytes, cap, F_in, F_out, *, x_itemsize, w_itemsize,
             logits_itemsize, probs_itemsize):
    """Largest batch tile (multiple of 8, <= cap) whose working set fits the budget."""
    # Pallas double-buffers every input/output BlockSpec -- including the grid-invariant
    # weight and bias -- so count them twice.
    resident = 2 * (F_in * F_out * w_itemsize + F_out * 4)
    per_row = 2 * (F_in * x_itemsize + F_out * (logits_itemsize + probs_itemsize))
    if resident + 8 * per_row > budget_bytes:
        # TODO(synk): for weights too large to stay VMEM-resident (relevant on v7x's
        # 64 MiB), add a K/N grid axis (reduction axis last, "arbitrary", f32
        # accumulator scratch + pl.when init/finalize) instead of failing.
        raise ValueError("SoftmaxLayer weight too large for a VMEM-resident kernel; "
                         "a K/N-tiled variant is required.")
    tb = cap
    while tb > 8 and resident + tb * per_row > budget_bytes:
        tb //= 2
    return tb


def softmax_layer_kernel(x_ref, w_ref, b_ref, logits_ref, probs_ref, *,
                         approx_reciprocal):
    # Linear: logits = x @ W^T + b (MXU matmul, f32 accumulation; bias add in f32).
    logits = jnp.dot(x_ref[...], w_ref[...],
                     preferred_element_type=jnp.float32) + b_ref[...]
    logits_ref[...] = logits.astype(logits_ref.dtype)

    # Numerically stable softmax over dim=1 (class axis is whole inside the block).
    m = jnp.max(logits, axis=1, keepdims=True)
    e = jnp.exp(logits - m)
    denom = jnp.sum(e, axis=1, keepdims=True)
    if approx_reciprocal:
        p = e * pl.reciprocal(denom, approx=True)  # EUP vrcp, ~1e-4 relative error
    else:
        p = e / denom                              # exact parity with torch.nn.Softmax
    probs_ref[...] = p.astype(probs_ref.dtype)


def softmax_layer(x, w, b, *, use_bf16_matmul=False, probs_dtype=jnp.float32,
                  approx_reciprocal=False, pad_f_in_to=None):
    """Forward of SoftmaxLayer.

    x: [B, F_in] f32; w: [F_out, F_in] f32 (nn.Linear layout); b: [F_out] f32.
    Returns (output_l, output) = (logits [B, F_out], softmax(logits, dim=1)).
    """
    B, F_in = x.shape
    F_out = w.shape[0]

    # Optional K (=F_in) padding to a lane/MXU-friendly multiple.  Off by default: this
    # kernel is writeback-bound and padding K inflates the streamed x bytes; enable only
    # when the matmul itself is the bottleneck (large F_in / F_out).
    if pad_f_in_to is not None and F_in % pad_f_in_to != 0:
        F_in_p = _round_up(F_in, pad_f_in_to)
        x = jnp.zeros((B, F_in_p), x.dtype).at[:, :F_in].set(x)
        w = jnp.zeros((F_out, F_in_p), w.dtype).at[:, :F_in].set(w)
        F_in = F_in_p

    # Kernel-friendly parameter layout.  Outputs stay UNPADDED along F_out: for small
    # class counts a 128-lane pad writes up to 16x the useful bytes, and this kernel is
    # write-bound, so masked (lane-partial) stores of exactly F_out columns are cheaper
    # and keep the softmax exact (no -inf padded columns to slice away).
    compute_dtype = jnp.bfloat16 if use_bf16_matmul else x.dtype
    w_t = w.T.astype(compute_dtype)                    # [F_in, F_out], VMEM-resident
    b_row = b.reshape(1, F_out).astype(jnp.float32)    # [1, F_out]
    x_c = x.astype(compute_dtype)                      # boundary cast halves x DMA on bf16 path
    logits_dtype = jnp.float32

    budget, vmem_limit = _vmem_budget_bytes()
    cap = 2048 if budget >= 80 * 1024 * 1024 else 512
    tb_max = _pick_tb(
        budget, cap, F_in, F_out,
        x_itemsize=jnp.dtype(compute_dtype).itemsize,
        w_itemsize=jnp.dtype(compute_dtype).itemsize,
        logits_itemsize=jnp.dtype(logits_dtype).itemsize,
        probs_itemsize=jnp.dtype(probs_dtype).itemsize,
    )

    # Batch tiling with minimal padding: fewest tiles that fit the budget, then shrink
    # the tile so the padded batch barely covers B (avoids up to ~2x wasted work).
    B8 = _round_up(B, 8)
    n_tiles = _cdiv(B8, tb_max)
    TB = _round_up(_cdiv(B8, n_tiles), 8)
    B_pad = n_tiles * TB
    x_p = x_c if B_pad == B else jnp.zeros((B_pad, F_in), x_c.dtype).at[:B].set(x_c)

    kernel = functools.partial(softmax_layer_kernel,
                               approx_reciprocal=approx_reciprocal)

    out_shapes = (
        jax.ShapeDtypeStruct((B_pad, F_out), logits_dtype),   # output_l (logits)
        jax.ShapeDtypeStruct((B_pad, F_out), probs_dtype),    # softmax(output_l)
    )
    logits_p, probs_p = pl.pallas_call(
        kernel,
        out_shape=out_shapes,
        grid_spec=pltpu.PrefetchScalarGridSpec(
            num_scalar_prefetch=0,
            grid=(B_pad // TB,),
            in_specs=[
                pl.BlockSpec((TB, F_in), lambda i: (i, 0)),     # streamed batch tile
                pl.BlockSpec((F_in, F_out), lambda i: (0, 0)),  # VMEM-resident weight
                pl.BlockSpec((1, F_out), lambda i: (0, 0)),     # VMEM-resident bias
            ],
            out_specs=[
                pl.BlockSpec((TB, F_out), lambda i: (i, 0)),
                pl.BlockSpec((TB, F_out), lambda i: (i, 0)),
            ],
        ),
        compiler_params=pltpu.CompilerParams(
            dimension_semantics=("parallel",),
            vmem_limit_bytes=vmem_limit,
        ),
    )(x_p, w_t, b_row)

    # Slice away batch padding only (no column padding to remove).
    return logits_p[:B], probs_p[:B]


if __name__ == "__main__":
    key = jax.random.PRNGKey(0)
    B, F_in, F_out = 8, 32, 5  # MIT-BIH head: 5 arrhythmia classes

    kx, kw, kb = jax.random.split(key, 3)
    x = jax.random.normal(kx, (B, F_in), dtype=jnp.float32)
    # Deterministic param init (mimic nn.Linear uniform(-1/sqrt(in), 1/sqrt(in)))
    bound = 1.0 / jnp.sqrt(jnp.float32(F_in))
    w = jax.random.uniform(kw, (F_out, F_in), dtype=jnp.float32, minval=-bound, maxval=bound)
    b = jax.random.uniform(kb, (F_out,), dtype=jnp.float32, minval=-bound, maxval=bound)

    logits, probs = softmax_layer(x, w, b)
    jax.block_until_ready((logits, probs))

    # Reference check in plain JAX.
    ref_logits = x @ w.T + b
    ref_probs = jax.nn.softmax(ref_logits, axis=1)
    assert logits.shape == (B, F_out) and probs.shape == (B, F_out)
    assert jnp.allclose(logits, ref_logits, atol=1e-4), \
        float(jnp.max(jnp.abs(logits - ref_logits)))
    assert jnp.allclose(probs, ref_probs, atol=1e-4), \
        float(jnp.max(jnp.abs(probs - ref_probs)))
    assert bool(jnp.allclose(jnp.sum(probs, axis=1), 1.0, atol=1e-3))

    print("KERNEL_OK")
</pallas_src>

<mosaic_0001>
module attributes {stable_mosaic.version = 11 : i64} {
  func.func @softmax_layer_kernel(%arg0: i32, %arg1: memref<8x32xf32, #tpu.memory_space<vmem>>, %arg2: memref<32x5xf32, #tpu.memory_space<vmem>>, %arg3: memref<1x5xf32, #tpu.memory_space<vmem>>, %arg4: memref<8x5xf32, #tpu.memory_space<vmem>>, %arg5: memref<8x5xf32, #tpu.memory_space<vmem>>) attributes {dimension_semantics = [#tpu.dimension_semantics<parallel>], iteration_bounds = array<i64: 1>, scalar_prefetch = 0 : i64, scratch_operands = 0 : i64, tpu.core_type = #tpu.core_type<tc>, window_params = [{transform_indices = @transform_0, window_bounds = array<i64: 8, 32>}, {pipeline_mode = #tpu.pipeline_mode<synchronous>, transform_indices = @transform_1, window_bounds = array<i64: 32, 5>}, {pipeline_mode = #tpu.pipeline_mode<synchronous>, transform_indices = @transform_2, window_bounds = array<i64: 1, 5>}, {transform_indices = @transform_3, window_bounds = array<i64: 8, 5>}, {transform_indices = @transform_4, window_bounds = array<i64: 8, 5>}]} {
    %c0 = arith.constant 0 : index
    %c0_0 = arith.constant 0 : index
    %0 = vector.load %arg1[%c0, %c0_0] : memref<8x32xf32, #tpu.memory_space<vmem>>, vector<8x32xf32>
    %c0_1 = arith.constant 0 : index
    %c0_2 = arith.constant 0 : index
    %1 = vector.load %arg2[%c0_1, %c0_2] : memref<32x5xf32, #tpu.memory_space<vmem>>, vector<32x5xf32>
    %cst = arith.constant dense<0.000000e+00> : vector<8x5xf32>
    %2 = tpu.matmul %0, %1, %cst {dimension_numbers = #tpu.dot_dimension_numbers<[1], [0], [0], [1], [0, 0, 1, 1], [], []>} : vector<8x32xf32>, vector<32x5xf32>, vector<8x5xf32> -> vector<8x5xf32>
    %c0_3 = arith.constant 0 : index
    %c0_4 = arith.constant 0 : index
    %3 = vector.load %arg3[%c0_3, %c0_4] : memref<1x5xf32, #tpu.memory_space<vmem>>, vector<1x5xf32>
    %4 = vector.broadcast %3 : vector<1x5xf32> to vector<8x5xf32>
    %5 = arith.addf %2, %4 : vector<8x5xf32>
    %c0_5 = arith.constant 0 : index
    %c0_6 = arith.constant 0 : index
    %6 = vector.load %arg4[%c0_5, %c0_6] : memref<8x5xf32, #tpu.memory_space<vmem>>, vector<8x5xf32>
    tpu.vector_store %arg4[%c0_5, %c0_6], %5 {strides = array<i32>} : memref<8x5xf32, #tpu.memory_space<vmem>>, vector<8x5xf32>,
    %cst_7 = arith.constant dense<0xFF800000> : vector<8xf32>
    %7 = vector.multi_reduction <maximumf>, %5, %cst_7 [1] : vector<8x5xf32> to vector<8xf32>
    %8 = vector.shape_cast %7 : vector<8xf32> to vector<8x1xf32>
    %9 = vector.broadcast %8 : vector<8x1xf32> to vector<8x5xf32>
    %10 = arith.subf %5, %9 : vector<8x5xf32>
    %11 = math.exp %10 : vector<8x5xf32>
    %cst_8 = arith.constant dense<0.000000e+00> : vector<8xf32>
    %12 = vector.multi_reduction <add>, %11, %cst_8 [1] : vector<8x5xf32> to vector<8xf32>
    %13 = vector.shape_cast %12 : vector<8xf32> to vector<8x1xf32>
    %14 = vector.broadcast %13 : vector<8x1xf32> to vector<8x5xf32>
    %15 = arith.divf %11, %14 : vector<8x5xf32>
    %c0_9 = arith.constant 0 : index
    %c0_10 = arith.constant 0 : index
    %16 = vector.load %arg5[%c0_9, %c0_10] : memref<8x5xf32, #tpu.memory_space<vmem>>, vector<8x5xf32>
    tpu.vector_store %arg5[%c0_9, %c0_10], %15 {strides = array<i32>} : memref<8x5xf32, #tpu.memory_space<vmem>>, vector<8x5xf32>,
    return
  }
  func.func @transform_0(%arg0: i32) -> (i32, i32) {
    %c0_i32 = arith.constant 0 : i32
    %c0_i32_0 = arith.constant 0 : i32
    return %arg0, %c0_i32 : i32, i32
  }
  func.func @transform_1(%arg0: i32) -> (i32, i32) {
    %c0_i32 = arith.constant 0 : i32
    %c0_i32_0 = arith.constant 0 : i32
    %c0_i32_1 = arith.constant 0 : i32
    return %c0_i32, %c0_i32_0 : i32, i32
  }
  func.func @transform_2(%arg0: i32) -> (i32, i32) {
    %c0_i32 = arith.constant 0 : i32
    %c0_i32_0 = arith.constant 0 : i32
    %c0_i32_1 = arith.constant 0 : i32
    return %c0_i32, %c0_i32_0 : i32, i32
  }
  func.func @transform_3(%arg0: i32) -> (i32, i32) {
    %c0_i32 = arith.constant 0 : i32
    %c0_i32_0 = arith.constant 0 : i32
    return %arg0, %c0_i32 : i32, i32
  }
  func.func @transform_4(%arg0: i32) -> (i32, i32) {
    %c0_i32 = arith.constant 0 : i32
    %c0_i32_0 = arith.constant 0 : i32
    return %arg0, %c0_i32 : i32, i32
  }
}

</mosaic_0001>

<bundles_post_ra>
// kernel: tpu_custom_call.1
= control target key start
LH: loop header
LB: loop body
LE: loop exit
PB: predicated region body
PF: predicated region fallthrough
CT: control target
= control target key end

     0   :  { %10 = vsyncpa [#allocation3], 0  ;;  %v227_v3 = vmov 0.0|0.0   ;;  %vm228_vm0 = vmmov 0   ;;  %v229_v6 = vmov 0.0   ;;  %s303_s0 = inlined_call_operand.vmem [shape: f32[8,32], index: 0, kind: input, shape index: {}]   ;;  %s304_s1 = inlined_call_operand.vmem [shape: f32[32,5], index: 1, kind: input, shape index: {}]   ;;  %s305_s2 = inlined_call_operand.vmem [shape: f32[1,5], index: 2, kind: input, shape index: {}]   ;;  %s306_s3 = inlined_call_operand.hbm [shape: f32[8,5], index: 3, kind: output, shape index: {0}]   ;;  %s307_s4 = inlined_call_operand.hbm [shape: f32[8,5], index: 4, kind: output, shape index: {1}]  }
   0x1   :  { %v19_v0 = vld [vmem:[%s304_s1] sm:$0xff]  ;;  %v20_v1 = vld [vmem:[%s304_s1 + $0x8] sm:$0xff]  ;;  %v21_v2 = vld [vmem:[%s304_s1 + $0x10] sm:$0xff]  ;;  %164 = vmatprep.subr.bf16.mxu0 %v227_v3  ;;  %161 = vmatprep.mubr.msk.f32.mxu0 %vm228_vm0, %v229_v6 }
   0x2   :  { %v165_v4 = vpack.c.bf16 %v20_v1, %v19_v0  ;;  %v22_v5 = vld [vmem:[%s304_s1 + $0x18] sm:$0xff] }
   0x3   :  { %11 = vsyncpa [#allocation5], 0  ;;  %v168_v7 = vpack.c.bf16 %v22_v5, %v21_v2  ;;  %v18_v8 = vld [vmem:[%s303_s0] sm:$0xff]  ;;  %vm30_vm1 = vcmask 261120   ;;  %vm104_vm2 = vcmask 39936   ;;  %s230_s0 = smov [#allocation2]  }
   0x4   :  { %166 = vmatpush3.bf16.msra.mxu0 %v165_v4  ;;  %v146_v9 = vld [vmem:[%s305_s2] ss:$0 sm:$0xff]  ;;  %s124_s1 = sshll.u32 %s230_s0, 4  ;;  %s125_s1 = int_to_ptr.vmem [resolvable:$true] %s124_s1 }
   0x5   :  { %167 = vmatprep.subr.bf16.mxu0 %v227_v3  ;;  %s179_s2 = scalar_lea.vmem %s125_s1, 128  ;;  %p184_p1 = scmp.lt.s32.totalorder %s125_s1, %s125_s1 }
   0x6   :  { %p180_p0 = scmp.ne.s32.totalorder %s125_s1, %s179_s2  ;;  %p185_p2 = scmp.lt.s32.totalorder %s179_s2, %s179_s2 }
   0x8   :  { %169 = vmatpush3.bf16.msra.mxu0 %v168_v7  ;;  %p186_p3 = por %p185_p2, %p184_p1 }
   0xa   :  { %p187_p4 = pnand %p186_p3, %p180_p0 }
   0xb   :  { %162 = vmatmul.mubr.msk.f32.vlgmr.msra.gmra.mrb[0].mxu0 %vm30_vm1, %v18_v8 }
  0xde   :  { %v100_v10 = vpop.f32.mrb[0].mxu0 }
  0xdf   :  { %v101_v11 = vadd.f32 %v146_v9, %v100_v10  ;;  %v163_v12 = vpop.f32.mrb[1].mxu0 }
  0xe1   :  { %v106_v13 = vsel %vm104_vm2, %v101_v11, -inf  ;;  %105 = vst.msk [vmem:[#allocation2] sm:$0xff] %vm104_vm2, %v101_v11 }
  0xe2   :  { %107 = vmax.xlane.f32.xlu0 %v106_v13 }
 0x16f   :  { %v108_v14 = vpop.xlane.xlu0 %107 }
 0x170   :  { %v109_v15 = vsub.f32 %v101_v11, %v108_v14 }
 0x172   :  { %v110_v16 = vmul.f32 1.442695, %v109_v15 }
 0x174   :  { %175 = vpow2.f32 %v110_v16 }
 0x17e   :  { %v176_v17 = vpop.eup %175 }
 0x17f   :  { %v112_v18 = vsel %vm104_vm2, %v176_v17, 0.0 }
 0x180   :  { %113 = vadd.xlane.f32.xlu0 %v112_v18 }
 0x181   :  { %190 = shalt.err (!%p187_p4)
}
 0x182   :  { %s191_s29 = scalar_lea.hbm %s306_s3, 128 }
 0x183   :  { %p192_p5 = scmp.ne.s32.totalorder %s306_s3, %s191_s29  ;;  %p195_p6 = scmp.lt.u32.totalorder %s191_s29, %s306_s3 }
 0x185   :  { %p197_p7 = pnand %p195_p6, %p192_p5 }
 0x187   :  { %200 = shalt.err (!%p197_p7)
}
 0x188   :  { %127 = dma.vmem_to_hbm [thread:$0]  %s125_s1, 128, %s306_s3, [#allocation3]  }
 0x189   :  { %s231_s10 = smov [#allocation4]  }
 0x18a   :  { %s134_s11 = sshll.u32 %s231_s10, 4  ;;  %s135_s11 = int_to_ptr.vmem [resolvable:$true] %s134_s11 }
 0x18b   :  { %s201_s12 = scalar_lea.vmem %s135_s11, 128  ;;  %p206_p9 = scmp.lt.s32.totalorder %s135_s11, %s135_s11 }
 0x18c   :  { %p202_p8 = scmp.ne.s32.totalorder %s135_s11, %s201_s12  ;;  %p207_p10 = scmp.lt.s32.totalorder %s201_s12, %s201_s12 }
 0x18e   :  { %p208_p11 = por %p207_p10, %p206_p9 }
 0x190   :  { %p209_p12 = pnand %p208_p11, %p202_p8 }
 0x20d   :  { %v114_v19 = vpop.xlane.xlu0 %113 }
 0x20e   :  { %177 = vrcp.f32 %v114_v19 }
 0x218   :  { %v178_v20 = vpop.eup %177 }
 0x219   :  { %v116_v21 = vmul.f32 %v178_v20, %v176_v17 }
 0x21b   :  { %117 = vst.msk [vmem:[#allocation4] sm:$0xff] %vm104_vm2, %v116_v21 }
 0x21c   :  { %212 = shalt.err (!%p209_p12)
}
 0x21d   :  { %s213_s3 = scalar_lea.hbm %s307_s4, 128 }
 0x21e   :  { %p214_p13 = scmp.ne.s32.totalorder %s307_s4, %s213_s3  ;;  %p217_p0 = scmp.lt.u32.totalorder %s213_s3, %s307_s4 }
 0x220   :  { %p219_p1 = pnand %p217_p0, %p214_p13 }
 0x222   :  { %222 = shalt.err (!%p219_p1)
}
 0x223   :  { %137 = dma.vmem_to_hbm [thread:$0]  %s135_s11, 128, %s307_s4, [#allocation5]  }
 0x224   :  { %223 = dma.done.wait [#allocation3], 128  }
 0x225   :  { %224 = vsyncadd [#allocation3], 4294967168 }
 0x226   :  { %225 = dma.done.wait [#allocation5], 128  }
 0x227   :  { %226 = vsyncadd [#allocation5], 4294967168 }
 0x228   :  { %144 = vsyncpa [#allocation3], 1 }
 0x229   :  { %145 = vsyncpa [#allocation5], 1 }

</bundles_post_ra>
